<compile_context>
chip_gen: v7x
topology: tpu7x:2x2x1
jax: 0.10.0
libtpu: 0.0.40
codegen_flags: <defaults>
</compile_context>

<pallas_src>
import functools

import jax
import jax.numpy as jnp
from jax.experimental import pallas as pl
from jax.experimental.pallas import tpu as pltpu


def _se_kernel(x_ref, w1_ref, w2_ref, o_ref):
    # x_ref: (BT, C, HW)   lane axis = flattened spatial (lane-dense)
    # w1_ref: (C, C//r)    w2_ref: (C//r, C)
    x = x_ref[...]                                        # (BT, C, HW) f32

    # Global average pool over spatial (single cross-lane reduction).
    inv_hw = jnp.float32(1.0 / x.shape[-1])
    pooled = jnp.sum(x, axis=-1) * inv_hw                 # (BT, C)

    # Squeeze-excite MLP: FC -> ReLU -> FC -> sigmoid.
    h = jnp.maximum(
        jnp.dot(pooled, w1_ref[...], preferred_element_type=jnp.float32), 0.0)
    gate = jax.nn.sigmoid(
        jnp.dot(h, w2_ref[...], preferred_element_type=jnp.float32))  # (BT, C)

    # Channel-wise rescale; gate broadcasts along the lane (spatial) axis,
    # so the store is a full unmasked lane-dense write.
    o_ref[...] = x * gate[:, :, None]


def se_block(x_nchw, fc1_w_t, fc2_w_t, *, batch_tile=None):
    """SEBlock forward.

    x_nchw:  (B, C, H, W) float32 (PyTorch NCHW layout).
    fc1_w_t: (C, C//r)  = torch fc[0].weight.T
    fc2_w_t: (C//r, C)  = torch fc[2].weight.T
    """
    B, C, H, W = x_nchw.shape
    HW = H * W
    Cr = fc1_w_t.shape[1]
    assert fc1_w_t.shape == (C, Cr) and fc2_w_t.shape == (Cr, C)

    # Free, contiguous reshape: spatial becomes the lane axis.
    x_flat = x_nchw.reshape(B, C, HW)

    bt = B if batch_tile is None else batch_tile
    grid = (pl.cdiv(B, bt),)

    out_flat = pl.pallas_call(
        _se_kernel,
        out_shape=jax.ShapeDtypeStruct((B, C, HW), jnp.float32),
        grid_spec=pltpu.PrefetchScalarGridSpec(
            num_scalar_prefetch=0,
            grid=grid,
            in_specs=[
                pl.BlockSpec((bt, C, HW), lambda i: (i, 0, 0)),
                pl.BlockSpec((C, Cr), lambda i: (0, 0)),
                pl.BlockSpec((Cr, C), lambda i: (0, 0)),
            ],
            out_specs=pl.BlockSpec((bt, C, HW), lambda i: (i, 0, 0)),
        ),
        compiler_params=pltpu.CompilerParams(
            dimension_semantics=("parallel",)),   # no-op on v5e/v6e, splits TCs on v7x
    )(x_flat, fc1_w_t, fc2_w_t)

    return out_flat.reshape(B, C, H, W)


def reference_forward(x, fc1_w_t, fc2_w_t):
    """Pure-JAX (XLA) reference of SEBlock.forward in NCHW."""
    pooled = jnp.mean(x, axis=(2, 3))                      # (B, C)
    gate = jax.nn.sigmoid(jnp.maximum(pooled @ fc1_w_t, 0.0) @ fc2_w_t)
    return x * gate[:, :, None, None]


if __name__ == "__main__":
    B, C, H, W = 2, 16, 16, 16
    RED = 4                                   # SEBlock(reduction=4) -> hidden = 4

    key = jax.random.PRNGKey(0)
    kx, k1, k2 = jax.random.split(key, 3)
    x = jax.random.normal(kx, (B, C, H, W), jnp.float32)
    fc1_w_t = 0.3 * jax.random.normal(k1, (C, C // RED), jnp.float32)
    fc2_w_t = 0.3 * jax.random.normal(k2, (C // RED, C), jnp.float32)

    out = jax.block_until_ready(se_block(x, fc1_w_t, fc2_w_t))
    ref = jax.block_until_ready(reference_forward(x, fc1_w_t, fc2_w_t))

    assert out.shape == (B, C, H, W)
    assert bool(jnp.allclose(out, ref, atol=1e-5, rtol=1e-5)), "mismatch vs reference"

    print("KERNEL_OK")
</pallas_src>

<mosaic_0001>
module attributes {stable_mosaic.version = 11 : i64} {
  func.func @_se_kernel(%arg0: i32, %arg1: memref<2x16x256xf32, #tpu.memory_space<vmem>>, %arg2: memref<16x4xf32, #tpu.memory_space<vmem>>, %arg3: memref<4x16xf32, #tpu.memory_space<vmem>>, %arg4: memref<2x16x256xf32, #tpu.memory_space<vmem>>) attributes {dimension_semantics = [#tpu.dimension_semantics<parallel>], iteration_bounds = array<i64: 1>, scalar_prefetch = 0 : i64, scratch_operands = 0 : i64, tpu.core_type = #tpu.core_type<tc>, window_params = [{transform_indices = @transform_0, window_bounds = array<i64: 2, 16, 256>}, {pipeline_mode = #tpu.pipeline_mode<synchronous>, transform_indices = @transform_1, window_bounds = array<i64: 16, 4>}, {pipeline_mode = #tpu.pipeline_mode<synchronous>, transform_indices = @transform_2, window_bounds = array<i64: 4, 16>}, {transform_indices = @transform_3, window_bounds = array<i64: 2, 16, 256>}]} {
    %c0 = arith.constant 0 : index
    %c0_0 = arith.constant 0 : index
    %c0_1 = arith.constant 0 : index
    %0 = vector.load %arg1[%c0, %c0_0, %c0_1] : memref<2x16x256xf32, #tpu.memory_space<vmem>>, vector<2x16x256xf32>
    %cst = arith.constant dense<0.000000e+00> : vector<2x16xf32>
    %1 = vector.multi_reduction <add>, %0, %cst [2] : vector<2x16x256xf32> to vector<2x16xf32>
    %cst_2 = arith.constant 3.906250e-03 : f32
    %2 = vector.broadcast %cst_2 : f32 to vector<2x16xf32>
    %3 = arith.mulf %1, %2 : vector<2x16xf32>
    %c0_3 = arith.constant 0 : index
    %c0_4 = arith.constant 0 : index
    %4 = vector.load %arg2[%c0_3, %c0_4] : memref<16x4xf32, #tpu.memory_space<vmem>>, vector<16x4xf32>
    %cst_5 = arith.constant dense<0.000000e+00> : vector<2x4xf32>
    %5 = tpu.matmul %3, %4, %cst_5 {dimension_numbers = #tpu.dot_dimension_numbers<[1], [0], [0], [1], [0, 0, 1, 1], [], []>} : vector<2x16xf32>, vector<16x4xf32>, vector<2x4xf32> -> vector<2x4xf32>
    %cst_6 = arith.constant 0.000000e+00 : f32
    %6 = vector.broadcast %cst_6 : f32 to vector<2x4xf32>
    %7 = arith.maximumf %5, %6 : vector<2x4xf32>
    %c0_7 = arith.constant 0 : index
    %c0_8 = arith.constant 0 : index
    %8 = vector.load %arg3[%c0_7, %c0_8] : memref<4x16xf32, #tpu.memory_space<vmem>>, vector<4x16xf32>
    %cst_9 = arith.constant dense<0.000000e+00> : vector<2x16xf32>
    %9 = tpu.matmul %7, %8, %cst_9 {dimension_numbers = #tpu.dot_dimension_numbers<[1], [0], [0], [1], [0, 0, 1, 1], [], []>} : vector<2x4xf32>, vector<4x16xf32>, vector<2x16xf32> -> vector<2x16xf32>
    %10 = arith.negf %9 : vector<2x16xf32>
    %11 = math.exp %10 : vector<2x16xf32>
    %cst_10 = arith.constant 1.000000e+00 : f32
    %12 = vector.broadcast %cst_10 : f32 to vector<2x16xf32>
    %13 = arith.addf %12, %11 : vector<2x16xf32>
    %14 = arith.divf %12, %13 : vector<2x16xf32>
    %15 = vector.shape_cast %14 : vector<2x16xf32> to vector<2x16x1xf32>
    %16 = vector.broadcast %15 : vector<2x16x1xf32> to vector<2x16x256xf32>
    %17 = arith.mulf %0, %16 : vector<2x16x256xf32>
    %c0_11 = arith.constant 0 : index
    %c0_12 = arith.constant 0 : index
    %c0_13 = arith.constant 0 : index
    %18 = vector.load %arg4[%c0_11, %c0_12, %c0_13] : memref<2x16x256xf32, #tpu.memory_space<vmem>>, vector<2x16x256xf32>
    tpu.vector_store %arg4[%c0_11, %c0_12, %c0_13], %17 {strides = array<i32>} : memref<2x16x256xf32, #tpu.memory_space<vmem>>, vector<2x16x256xf32>,
    return
  }
  func.func @transform_0(%arg0: i32) -> (i32, i32, i32) {
    %c0_i32 = arith.constant 0 : i32
    %c0_i32_0 = arith.constant 0 : i32
    %c0_i32_1 = arith.constant 0 : i32
    return %arg0, %c0_i32, %c0_i32_0 : i32, i32, i32
  }
  func.func @transform_1(%arg0: i32) -> (i32, i32) {
    %c0_i32 = arith.constant 0 : i32
    %c0_i32_0 = arith.constant 0 : i32
    %c0_i32_1 = arith.constant 0 : i32
    return %c0_i32, %c0_i32_0 : i32, i32
  }
  func.func @transform_2(%arg0: i32) -> (i32, i32) {
    %c0_i32 = arith.constant 0 : i32
    %c0_i32_0 = arith.constant 0 : i32
    %c0_i32_1 = arith.constant 0 : i32
    return %c0_i32, %c0_i32_0 : i32, i32
  }
  func.func @transform_3(%arg0: i32) -> (i32, i32, i32) {
    %c0_i32 = arith.constant 0 : i32
    %c0_i32_0 = arith.constant 0 : i32
    %c0_i32_1 = arith.constant 0 : i32
    return %arg0, %c0_i32, %c0_i32_0 : i32, i32, i32
  }
}

</mosaic_0001>

<bundles_post_ra>
// kernel: tpu_custom_call.1
= control target key start
LH: loop header
LB: loop body
LE: loop exit
PB: predicated region body
PF: predicated region fallthrough
CT: control target
= control target key end

     0   :  { %8 = vsyncpa [#allocation3], 0  ;;  %s478_s0 = inlined_call_operand.hbm [shape: f32[2,16,256], index: 0, kind: input, shape index: {}]   ;;  %s479_s1 = inlined_call_operand.vmem [shape: f32[16,4], index: 1, kind: input, shape index: {}]   ;;  %s480_s2 = inlined_call_operand.vmem [shape: f32[4,16], index: 2, kind: input, shape index: {}]   ;;  %s481_s3 = inlined_call_operand.hbm [shape: f32[2,16,256], index: 3, kind: output, shape index: {}]  }
   0x1   :  { %9 = vsyncpa [#allocation4], 0  ;;  %s380_s12 = smov [#allocation2]   ;;  %s332_s16 = scalar_lea.hbm %s478_s0, 1024 }
   0x2   :  { %s15_s13 = sshll.u32 %s380_s12, 4  ;;  %p333_p0 = scmp.ne.s32.totalorder %s478_s0, %s332_s16  ;;  %s16_s13 = int_to_ptr.vmem [resolvable:$true] %s15_s13 }
   0x3   :  { %p336_p1 = scmp.lt.u32.totalorder %s332_s16, %s478_s0 }
   0x5   :  { %p338_p2 = pnand %p336_p1, %p333_p0 }
   0x7   :  { %341 = shalt.err (!%p338_p2)
}
   0x8   :  { %s342_s21 = scalar_lea.vmem %s16_s13, 1024  ;;  %p347_p4 = scmp.lt.s32.totalorder %s16_s13, %s16_s13 }
   0x9   :  { %p343_p3 = scmp.ne.s32.totalorder %s16_s13, %s342_s21  ;;  %p348_p5 = scmp.lt.s32.totalorder %s342_s21, %s342_s21 }
   0xb   :  { %p349_p6 = por %p348_p5, %p347_p4 }
   0xd   :  { %p350_p7 = pnand %p349_p6, %p343_p3 }
   0xf   :  { %353 = shalt.err (!%p350_p7)
}
  0x10   :  { %s381_s22 = smov 256   ;;  %s382_s23 = smov 16  }
  0x11   :  { %21 = dma.hbm_to_vmem [thread:$0]  %s478_s0, 1024, %s16_s13, [#allocation3], %s381_s22, %s381_s22, %s382_s23  }
  0x12   :  { %376 = dma.done.wait [#allocation3], 1024  }
  0x13   :  { %377 = vsyncadd [#allocation3], 4294966272  ;;  %v422_v0 = vld [vmem:[#allocation2 + $0x20] sm:$0xff]  ;;  %v424_v1 = vld [vmem:[#allocation2 + $0x28] sm:$0xff]  ;;  %v383_v15 = vmov 0.0|0.0   ;;  %vm384_vm0 = vmmov 0   ;;  %v59_v17 = vlaneseq }
  0x14   :  { %v426_v2 = vld [vmem:[#allocation2] sm:$0xff]  ;;  %v43_v3 = vadd.f32 %v424_v1, %v422_v0  ;;  %v430_v4 = vld [vmem:[#allocation2 + $0x8] sm:$0xff]  ;;  %v432_v5 = vld [vmem:[#allocation2 + $0x30] sm:$0xff]  ;;  %318 = vmatprep.subr.bf16.mxu0 %v383_v15  ;;  %v385_v16 = vmov 0.0   ;;  %vm70_vm1 = vcmask 130112   ;;  %vm81_vm2 = vcmask 1041409  }
  0x15   :  { %v434_v6 = vld [vmem:[#allocation2 + $0x38] sm:$0xff]  ;;  %v37_v7 = vadd.f32 %v430_v4, %v426_v2  ;;  %v438_v8 = vld [vmem:[#allocation2 + $0x10] sm:$0xff]  ;;  %v53_v12 = vld [vmem:[%s479_s1] sm:$0xff]  ;;  %310 = vmatprep.mubr.msk.f32.mxu0 %vm384_vm0, %v385_v16  ;;  %313 = vmatprep.subr.mxu1 %v385_v16  ;;  %v60_v18 = vand.u32 127, %v59_v17  ;;  %v62_v19 = vshrl.u32 %v59_v17, 7  ;;  %vm83_vm3 = vcmask 130048  }
  0x16   :  { %v440_v9 = vld [vmem:[#allocation2 + $0x18] sm:$0xff]  ;;  %44 = vadd.xlane.f32.xlu1 %v43_v3  ;;  %v46_v10 = vadd.f32 %v434_v6, %v432_v5  ;;  %v54_v13 = vld [vmem:[%s479_s1 + $0x8] sm:$0xff]  ;;  %315 = vmatprep.mubr.msk.f32.mxu1 %vm384_vm0, %v385_v16  ;;  %v157_v38 = vld [vmem:[%s480_s2] sm:$0xf]  ;;  %vm162_vm4 = vcmask 1043456   ;;  %vm158_vm5 = vcmask 31744  }
  0x17   :  { %38 = vadd.xlane.f32.xlu0 %v37_v7  ;;  %v40_v11 = vadd.f32 %v440_v9, %v438_v8  ;;  %v319_v14 = vpack.c.bf16 %v54_v13, %v53_v12  ;;  %v65_v20 = vadd.s32 4294967288, %v60_v18  ;;  %v63_v23 = vsub.s32 %v60_v18, %v62_v19  ;;  %314 = vmatpush3.msk.msra.mxu1 %vm162_vm4, %v157_v38  ;;  %s386_s2 = smov [#allocation5]  }
  0x18   :  { %v244_v47 = vsub.s32 0, %v62_v19  ;;  %v255_v50 = vsub.s32 1, %v62_v19  ;;  %s285_s30 = sshll.u32 %s386_s2, 4  ;;  %s286_s30 = int_to_ptr.vmem [resolvable:$true] %s285_s30 }
  0x19   :  { %320 = vmatpush3.bf16.msra.mxu0 %v319_v14  ;;  %v68_v25 = vsub.s32 %v65_v20, %v62_v19  ;;  %s354_s4 = scalar_lea.vmem %s286_s30, 1024  ;;  %p359_p9 = scmp.lt.s32.totalorder %s286_s30, %s286_s30 }
  0x1a   :  { %47 = vadd.xlane.f32.xlu1 %v46_v10  ;;  %p355_p8 = scmp.ne.s32.totalorder %s286_s30, %s354_s4  ;;  %p360_p10 = scmp.lt.s32.totalorder %s354_s4, %s354_s4 }
  0x1b   :  { %41 = vadd.xlane.f32.xlu0 %v40_v11 }
  0x1c   :  { %p361_p11 = por %p360_p10, %p359_p9 }
  0x1e   :  { %p362_p12 = pnand %p361_p11, %p355_p8 }
  0xa3   :  { %v45_v21 = vpop.xlane.xlu1 %44 }
  0xa4   :  { %v39_v22 = vpop.xlane.xlu0 %38  ;;  %v51_v24 = vmul.f32 0.00390625, %v45_v21 }
  0xa5   :  { %v49_v26 = vmul.f32 0.00390625, %v39_v22 }
  0xa6   :  { %v75_v31 = vrot.slane %v51_v24, %v63_v23 }
  0xa7   :  { %v48_v27 = vpop.xlane.xlu1 %47  ;;  %v64_v33 = vrot.slane %v49_v26, %v63_v23 }
  0xa8   :  { %v52_v28 = vmul.f32 0.00390625, %v48_v27  ;;  %v42_v29 = vpop.xlane.xlu0 %41 }
  0xa9   :  { %v50_v30 = vmul.f32 0.00390625, %v42_v29 }
  0xaa   :  { %v79_v32 = vrot.slane %v52_v28, %v68_v25 }
  0xab   :  { %v69_v34 = vrot.slane %v50_v30, %v68_v25 }
  0xac   :  { %v80_v35 = vsel %vm70_vm1, %v79_v32, %v75_v31 }
  0xad   :  { %v71_v36 = vsel %vm70_vm1, %v69_v34, %v64_v33 }
  0xae   :  { %v82_v37 = vsel %vm81_vm2, %v80_v35, %v71_v36 }
  0xaf   :  { %311 = vmatmul.mubr.msk.f32.vlgmr.msra.gmra.mrb[0].mxu0 %vm83_vm3, %v82_v37 }
 0x182   :  { %v152_v39 = vpop.f32.mrb[0].mxu0 }
 0x183   :  { %v156_v40 = vmax.f32 %v152_v39, 0.0  ;;  %v312_v41 = vpop.f32.mrb[1].mxu0 }
 0x185   :  { %316 = vmatmul.mubr.msk.f32.vlgmr.msra.gmra.mrb[0].mxu1 %vm158_vm5, %v156_v40 }
 0x258   :  { %v232_v42 = vpop.f32.mrb[0].mxu1 }
 0x259   :  { %v300_v43 = vmul.f32 -1.442695, %v232_v42  ;;  %v317_v44 = vpop.f32.mrb[1].mxu1 }
 0x25b   :  { %328 = vpow2.f32 %v300_v43 }
 0x265   :  { %v329_v45 = vpop.eup %328 }
 0x266   :  { %v239_v46 = vadd.f32 1.0, %v329_v45 }
 0x268   :  { %330 = vrcp.f32 %v239_v46 }
 0x272   :  { %v331_v48 = vpop.eup %330 }
 0x273   :  { %v245_v49 = vrot.slane %v331_v48, %v244_v47  ;;  %v256_v51 = vrot.slane %v331_v48, %v255_v50 }
 0x275   :  { %251 = vbcast.lane.b32.xlu1 %v245_v49, 264  ;;  %247 = vbcast.lane.b32.xlu0 %v245_v49, 256 }
 0x279   :  { %258 = vbcast.lane.b32.xlu1 %v256_v51, 256 }
 0x27d   :  { %262 = vbcast.lane.b32.xlu1 %v256_v51, 264 }
 0x2e7   :  { %v252_v52 = vpop.permute.xlu1 %251  ;;  %v248_v53 = vpop.permute.xlu0 %247 }
 0x2e8   :  { %v266_v54 = vmul.f32 %v252_v52, %v438_v8  ;;  %v267_v55 = vmul.f32 %v252_v52, %v440_v9  ;;  %v264_v56 = vmul.f32 %v248_v53, %v426_v2  ;;  %v265_v57 = vmul.f32 %v248_v53, %v430_v4 }
 0x2ea   :  { %274 = vst [vmem:[#allocation5 + $0x10] sm:$0xff] %v266_v54  ;;  %275 = vst [vmem:[#allocation5 + $0x18] sm:$0xff] %v267_v55 }
 0x2eb   :  { %272 = vst [vmem:[#allocation5] sm:$0xff] %v264_v56  ;;  %273 = vst [vmem:[#allocation5 + $0x8] sm:$0xff] %v265_v57  ;;  %v259_v58 = vpop.permute.xlu1 %258 }
 0x2ec   :  { %v268_v59 = vmul.f32 %v259_v58, %v422_v0  ;;  %v269_v60 = vmul.f32 %v259_v58, %v424_v1 }
 0x2ee   :  { %276 = vst [vmem:[#allocation5 + $0x20] sm:$0xff] %v268_v59  ;;  %277 = vst [vmem:[#allocation5 + $0x28] sm:$0xff] %v269_v60 }
 0x2ef   :  { %v263_v61 = vpop.permute.xlu1 %262 }
 0x2f0   :  { %v270_v62 = vmul.f32 %v263_v61, %v432_v5  ;;  %v271_v63 = vmul.f32 %v263_v61, %v434_v6 }
 0x2f2   :  { %278 = vst [vmem:[#allocation5 + $0x30] sm:$0xff] %v270_v62  ;;  %279 = vst [vmem:[#allocation5 + $0x38] sm:$0xff] %v271_v63 }
 0x2f3   :  { %365 = shalt.err (!%p362_p12)
}
 0x2f4   :  { %s366_s7 = scalar_lea.hbm %s481_s3, 1024 }
 0x2f5   :  { %p367_p13 = scmp.ne.s32.totalorder %s481_s3, %s366_s7  ;;  %p370_p0 = scmp.lt.u32.totalorder %s366_s7, %s481_s3 }
 0x2f7   :  { %p372_p1 = pnand %p370_p0, %p367_p13 }
 0x2f9   :  { %375 = shalt.err (!%p372_p1)
}
 0x2fa   :  { %291 = dma.vmem_to_hbm [thread:$0]  %s286_s30, 1024, %s481_s3, [#allocation4], %s381_s22, %s381_s22, %s382_s23  }
 0x2fb   :  { %378 = dma.done.wait [#allocation4], 1024  }
 0x2fc   :  { %379 = vsyncadd [#allocation4], 4294966272 }
 0x2fd   :  { %295 = vsyncpa [#allocation3], 1 }
 0x2fe   :  { %296 = vsyncpa [#allocation4], 1 }

</bundles_post_ra>
